<compile_context>
chip_gen: v7x
topology: tpu7x:2x2x1
jax: 0.10.0
libtpu: 0.0.40
codegen_flags: <defaults>
</compile_context>

<pallas_src>
from functools import partial

import jax
import jax.numpy as jnp
from jax.experimental import pallas as pl
from jax.experimental.pallas import tpu as pltpu

_LANES = 128
_MAX_TILE_ROWS = 1024  # multiple of 32 -> valid sublane tiling for f32/bf16/int8


def _heaviside_kernel(x_ref, o_ref):
    o_ref[...] = (x_ref[...] >= 0).astype(o_ref.dtype)


def _sigmoid_kernel(x_ref, o_ref, *, alpha):
    x = x_ref[...]
    o_ref[...] = jax.nn.sigmoid(x * jnp.asarray(alpha, x.dtype)).astype(o_ref.dtype)


@partial(jax.jit, static_argnames=("alpha", "spiking"))
def _sigmoid_forward(x, *, alpha, spiking):
    orig_shape = x.shape
    dtype = x.dtype
    n = x.size

    x_flat = x.reshape(-1)
    n_pad = pl.cdiv(n, _LANES) * _LANES
    if n_pad != n:
        # Only pay this extra pass when the element count is not lane-aligned.
        x_flat = jnp.pad(x_flat, (0, n_pad - n))
    rows = n_pad // _LANES

    if rows <= _MAX_TILE_ROWS:
        # Full-extent block: always a legal tiling, grid of 1 for tiny inputs.
        tile_rows = rows
    else:
        tile_rows = _MAX_TILE_ROWS

    grid = (pl.cdiv(rows, tile_rows),)

    if spiking:
        kernel = _heaviside_kernel
    else:
        kernel = partial(_sigmoid_kernel, alpha=alpha)

    x2d = x_flat.reshape(rows, _LANES)
    out2d = pl.pallas_call(
        kernel,
        out_shape=jax.ShapeDtypeStruct((rows, _LANES), dtype),
        grid=grid,
        in_specs=[pl.BlockSpec((tile_rows, _LANES), lambda i: (i, 0))],
        out_specs=pl.BlockSpec((tile_rows, _LANES), lambda i: (i, 0)),
        compiler_params=pltpu.CompilerParams(dimension_semantics=("parallel",)),
    )(x2d)

    out_flat = out2d.reshape(-1)
    if n_pad != n:
        out_flat = out_flat[:n]
    return out_flat.reshape(orig_shape)


class Sigmoid:
    """JAX/Pallas port of spikingjelly.clock_driven.surrogate.Sigmoid (forward only)."""

    def __init__(self, alpha: float = 1.0, spiking: bool = True):
        self.alpha = float(alpha)
        self.spiking = bool(spiking)
        # TODO(synk): surrogate gradient (backward) not implemented; only forward pass.

    def __call__(self, x: jax.Array) -> jax.Array:
        return _sigmoid_forward(x, alpha=self.alpha, spiking=self.spiking)


if __name__ == "__main__":
    key = jax.random.PRNGKey(0)
    x = jax.random.normal(key, (2, 4, 16, 16), dtype=jnp.float32)

    # spiking=True -> heaviside forward
    mod_spiking = Sigmoid(alpha=1.0, spiking=True)
    y_spike = jax.block_until_ready(mod_spiking(x))
    ref_spike = (x >= 0).astype(x.dtype)
    assert y_spike.shape == x.shape and y_spike.dtype == x.dtype
    assert jnp.array_equal(y_spike, ref_spike)

    # spiking=False -> sigmoid(alpha * x) forward
    mod_prim = Sigmoid(alpha=2.0, spiking=False)
    y_prim = jax.block_until_ready(mod_prim(x))
    ref_prim = jax.nn.sigmoid(2.0 * x)
    assert y_prim.shape == x.shape and y_prim.dtype == x.dtype
    assert jnp.allclose(y_prim, ref_prim, atol=1e-6)

    # non-lane-aligned shape exercises the pad/slice path
    x_odd = jax.random.normal(jax.random.PRNGKey(1), (3, 5, 7), dtype=jnp.float32)
    y_odd = jax.block_until_ready(mod_spiking(x_odd))
    assert jnp.array_equal(y_odd, (x_odd >= 0).astype(x_odd.dtype))

    print("KERNEL_OK")
</pallas_src>

<mosaic_0001>
module attributes {stable_mosaic.version = 11 : i64} {
  func.func @_heaviside_kernel(%arg0: i32, %arg1: memref<16x128xf32, #tpu.memory_space<vmem>>, %arg2: memref<16x128xf32, #tpu.memory_space<vmem>>) attributes {dimension_semantics = [#tpu.dimension_semantics<parallel>], iteration_bounds = array<i64: 1>, scalar_prefetch = 0 : i64, scratch_operands = 0 : i64, tpu.core_type = #tpu.core_type<tc>, window_params = [{transform_indices = @transform_0, window_bounds = array<i64: 16, 128>}, {transform_indices = @transform_1, window_bounds = array<i64: 16, 128>}]} {
    %c0 = arith.constant 0 : index
    %c0_0 = arith.constant 0 : index
    %0 = vector.load %arg1[%c0, %c0_0] : memref<16x128xf32, #tpu.memory_space<vmem>>, vector<16x128xf32>
    %cst = arith.constant 0.000000e+00 : f32
    %1 = vector.broadcast %cst : f32 to vector<16x128xf32>
    %2 = arith.cmpf oge, %0, %1 : vector<16x128xf32>
    %3 = arith.extui %2 : vector<16x128xi1> to vector<16x128xi32>
    %4 = arith.sitofp %3 : vector<16x128xi32> to vector<16x128xf32>
    %c0_1 = arith.constant 0 : index
    %c0_2 = arith.constant 0 : index
    %5 = vector.load %arg2[%c0_1, %c0_2] : memref<16x128xf32, #tpu.memory_space<vmem>>, vector<16x128xf32>
    tpu.vector_store %arg2[%c0_1, %c0_2], %4 {strides = array<i32>} : memref<16x128xf32, #tpu.memory_space<vmem>>, vector<16x128xf32>,
    return
  }
  func.func @transform_0(%arg0: i32) -> (i32, i32) {
    %c0_i32 = arith.constant 0 : i32
    %c0_i32_0 = arith.constant 0 : i32
    return %arg0, %c0_i32 : i32, i32
  }
  func.func @transform_1(%arg0: i32) -> (i32, i32) {
    %c0_i32 = arith.constant 0 : i32
    %c0_i32_0 = arith.constant 0 : i32
    return %arg0, %c0_i32 : i32, i32
  }
}

</mosaic_0001>

<bundles_post_ra>
// kernel: _sigmoid_forward.1
= control target key start
LH: loop header
LB: loop body
LE: loop exit
PB: predicated region body
PF: predicated region fallthrough
CT: control target
= control target key end

     0   :  { %v25_v2 = vmov 0.0   ;;  %s48_s0 = inlined_call_operand.vmem [shape: f32[16,128], index: 0, kind: input, shape index: {}]   ;;  %s49_s1 = inlined_call_operand.vmem [shape: f32[16,128], index: 1, kind: output, shape index: {}]  }
   0x1   :  { %v8_v0 = vld [vmem:[%s48_s0] sm:$0xff]  ;;  %v9_v1 = vld [vmem:[%s48_s0 + $0x8] sm:$0xff] }
   0x2   :  { %vm10_vm0 = vcmp.ge.f32.partialorder %v8_v0, 0.0  ;;  %vm11_vm1 = vcmp.ge.f32.partialorder %v9_v1, 0.0 }
   0x3   :  { %v22_v3 = vsel %vm10_vm0, 1.0, %v25_v2  ;;  %v23_v4 = vsel %vm11_vm1, 1.0, %v25_v2 }
   0x4   :  { %16 = vst [vmem:[%s49_s1] sm:$0xff] %v22_v3  ;;  %17 = vst [vmem:[%s49_s1 + $0x8] sm:$0xff] %v23_v4 }

</bundles_post_ra>
